<compile_context>
chip_gen: v6e
topology: v6e:2x2x1
jax: 0.10.0
libtpu: 0.0.40
codegen_flags: <defaults>
</compile_context>

<pallas_src>
import jax
import jax.numpy as jnp
from jax import lax
from jax.experimental import pallas as pl
from jax.experimental.pallas import tpu as pltpu

_EPS = 1e-5


# --------------------------------------------------------------------------- helpers
def _vmem_capacity_bytes():
    try:
        return int(pltpu.get_tpu_info().vmem_capacity_bytes)
    except Exception:
        return 64 * 2**20  # conservative fallback (v7x per-TC VMEM)


def _clamp_vmem_limit(est_bytes, cap):
    lo = 16 * 2**20
    hi = max(lo, int(cap) * 3 // 4)  # leave headroom for compiler scratch (v7x!)
    return int(min(hi, max(lo, 2 * int(est_bytes))))


def _pick_th(H, W, Cin, Cmid, N, budget_bytes):
    """Largest divisor of H whose per-step working set fits the budget. Tiles are only
    shrunk further when N == 1 (so a 2nd v7x core / the DMA pipeline has work); on
    1-TC chips big tiles keep the mem-bound kernel near the HBM roofline."""
    divisors = [d for d in range(1, H + 1) if H % d == 0]

    def working_set(th):
        return (2 * th * W * (Cin + Cmid) * 2        # double-buffered bf16 in/out blocks
                + th * W * (2 * Cin + 2 * Cmid) * 4)  # f32 intermediates

    fitting = [d for d in divisors if working_set(d) <= budget_bytes] or [1]
    th = max(fitting)
    if N == 1 and H // th < 2:
        smaller = [d for d in fitting if H // d >= 2]
        if smaller:
            th = max(smaller)
    return th


def _fold_bn(gamma, beta, mean, msq, eps=_EPS):
    var = jnp.maximum(msq - mean * mean, 0.0)  # single-pass var can go slightly negative
    scale = gamma / jnp.sqrt(var + eps)
    bias = beta - mean * scale
    return (scale[None, :].astype(jnp.float32),
            bias[None, :].astype(jnp.float32))


# --------------------------------------------------------------------------- stage 1
def _stage1_kernel(x_ref, scale_ref, bias_ref, w_ref, z_ref, s_ref, ss_ref):
    # x_ref: (TH, W, Cin) bf16 | scale/bias: (1, Cin) f32 | w_ref: (Cin, Cmid) bf16
    # z_ref: (TH, W, Cmid) bf16 | s_ref/ss_ref: (1, Cmid) f32 partial sums for BN2
    x = x_ref[...].astype(jnp.float32)
    y = jnp.maximum(x * scale_ref[0] + bias_ref[0], 0.0)     # BN(folded)+ReLU, f32 VPU
    th, wd, cin = y.shape
    cmid = w_ref.shape[1]
    # 1x1 conv == channel matmul on the MXU (bf16 operands, f32 accumulate). The
    # (TH,W)->(TH*W) collapse may relayout when W % 8 != 0; 2-D dot is the proven path.
    z = jnp.dot(y.astype(jnp.bfloat16).reshape(th * wd, cin), w_ref[...],
                preferred_element_type=jnp.float32)          # (TH*W, Cmid)
    z_ref[...] = z.reshape(th, wd, cmid).astype(z_ref.dtype)
    # BN2 batch-stat partial sums -> no extra HBM pass over the intermediate.
    s_ref[...] = jnp.sum(z, axis=0, keepdims=True)
    ss_ref[...] = jnp.sum(z * z, axis=0, keepdims=True)


def _stage1(x, scale, bias, w1, th, vmem_cap):
    N, H, W, Cin = x.shape
    Cmid = w1.shape[1]
    grid = (N, H // th)
    est = (2 * th * W * (Cin + Cmid) * 2
           + th * W * (2 * Cin + 2 * Cmid) * 4
           + 2 * (Cin * Cmid * 2 + 4 * (Cin + Cmid) * 4))
    cost = pl.CostEstimate(
        flops=2 * N * H * W * Cin * Cmid + 4 * N * H * W * Cin,
        transcendentals=0,
        bytes_accessed=N * H * W * (Cin + Cmid) * 2 + Cin * Cmid * 2 + 4 * Cin * 4)
    return pl.pallas_call(
        _stage1_kernel,
        out_shape=(jax.ShapeDtypeStruct((N, H, W, Cmid), jnp.bfloat16),
                   jax.ShapeDtypeStruct((N, H // th, 1, Cmid), jnp.float32),
                   jax.ShapeDtypeStruct((N, H // th, 1, Cmid), jnp.float32)),
        grid_spec=pltpu.PrefetchScalarGridSpec(
            num_scalar_prefetch=0,
            grid=grid,
            in_specs=[
                pl.BlockSpec((pl.Squeezed(), th, W, Cin), lambda n, h: (n, h, 0, 0)),
                pl.BlockSpec((1, Cin), lambda n, h: (0, 0)),
                pl.BlockSpec((1, Cin), lambda n, h: (0, 0)),
                pl.BlockSpec((Cin, Cmid), lambda n, h: (0, 0)),
            ],
            out_specs=[
                pl.BlockSpec((pl.Squeezed(), th, W, Cmid), lambda n, h: (n, h, 0, 0)),
                pl.BlockSpec((pl.Squeezed(), pl.Squeezed(), 1, Cmid),
                             lambda n, h: (n, h, 0, 0)),
                pl.BlockSpec((pl.Squeezed(), pl.Squeezed(), 1, Cmid),
                             lambda n, h: (n, h, 0, 0)),
            ],
        ),
        compiler_params=pltpu.CompilerParams(
            dimension_semantics=("parallel", "parallel"),
            vmem_limit_bytes=_clamp_vmem_limit(est, vmem_cap),
        ),
        cost_estimate=cost,
    )(x, scale, bias, w1)


# --------------------------------------------------------------------------- stage 2
def _stage2_kernel(z_ref, scale_ref, bias_ref, w_ref, g_ref, s_ref, ss_ref, pad_ref):
    # z_ref: (H, W, Cm) bf16 | scale/bias: (1, Cm) f32 | w_ref: (9, Cm, G) bf16
    # g_ref: (H, W, G) bf16 | s_/ss_: (1, G) f32 | pad_ref: (H+2, W+16, Cm) f32 scratch
    h, w, cm = z_ref.shape
    g = w_ref.shape[2]
    z = z_ref[...].astype(jnp.float32)
    y = jnp.maximum(z * scale_ref[0] + bias_ref[0], 0.0)      # BN(folded)+ReLU, f32 VPU
    # Zero-haloed copy of y; interior starts at sublane offset 8 (aligned store).
    pad_ref[...] = jnp.zeros_like(pad_ref)
    pad_ref[1:h + 1, 8:8 + w, :] = y
    # 3x3 "same" conv as 9 shifted channel-matmuls on the MXU, f32 accumulation.
    acc = jnp.zeros((h * w, g), jnp.float32)
    for dh in range(3):
        for dw in range(3):
            patch = pad_ref[dh:dh + h, 7 + dw:7 + dw + w, :]  # (H, W, Cm) f32
            acc = acc + jnp.dot(patch.reshape(h * w, cm).astype(jnp.bfloat16),
                                w_ref[dh * 3 + dw],
                                preferred_element_type=jnp.float32)
    g_ref[...] = acc.reshape(h, w, g).astype(g_ref.dtype)
    # Batch-stat partial sums of the new growth channels for the next layer's BN1.
    s_ref[...] = jnp.sum(acc, axis=0, keepdims=True)
    ss_ref[...] = jnp.sum(acc * acc, axis=0, keepdims=True)


def _stage2(z, scale, bias, w2r, vmem_cap):
    N, H, W, Cm = z.shape
    G = w2r.shape[2]
    est = (2 * H * W * (Cm + G) * 2
           + (H + 2) * (W + 16) * Cm * 4
           + H * W * (2 * Cm + 2 * G) * 4
           + 2 * (9 * Cm * G * 2 + 4 * Cm * 4 + 4 * G * 4))
    cost = pl.CostEstimate(
        flops=18 * N * H * W * Cm * G + 4 * N * H * W * Cm,
        transcendentals=0,
        bytes_accessed=N * H * W * (Cm + G) * 2 + 9 * Cm * G * 2 + 4 * Cm * 4)
    return pl.pallas_call(
        _stage2_kernel,
        out_shape=(jax.ShapeDtypeStruct((N, H, W, G), jnp.bfloat16),
                   jax.ShapeDtypeStruct((N, 1, G), jnp.float32),
                   jax.ShapeDtypeStruct((N, 1, G), jnp.float32)),
        grid_spec=pltpu.PrefetchScalarGridSpec(
            num_scalar_prefetch=0,
            grid=(N,),
            in_specs=[
                pl.BlockSpec((pl.Squeezed(), H, W, Cm), lambda n: (n, 0, 0, 0)),
                pl.BlockSpec((1, Cm), lambda n: (0, 0)),
                pl.BlockSpec((1, Cm), lambda n: (0, 0)),
                pl.BlockSpec((9, Cm, G), lambda n: (0, 0, 0)),
            ],
            out_specs=[
                pl.BlockSpec((pl.Squeezed(), H, W, G), lambda n: (n, 0, 0, 0)),
                pl.BlockSpec((pl.Squeezed(), 1, G), lambda n: (n, 0, 0)),
                pl.BlockSpec((pl.Squeezed(), 1, G), lambda n: (n, 0, 0)),
            ],
            scratch_shapes=[pltpu.VMEM((H + 2, W + 16, Cm), jnp.float32)],
        ),
        compiler_params=pltpu.CompilerParams(
            dimension_semantics=("parallel",),
            vmem_limit_bytes=_clamp_vmem_limit(est, vmem_cap),
        ),
        cost_estimate=cost,
    )(z, scale, bias, w2r)


# --------------------------------------------------------------------------- block
def dense_block_forward(x_nchw, params, eps=_EPS):
    """x_nchw: (N, C0, H, W) f32 -> (N, C0 + nBlocks*growth, H, W) f32."""
    N, C0, H, W = x_nchw.shape
    assert H >= 1 and W >= 1
    vmem_cap = _vmem_capacity_bytes()

    # One NCHW->NHWC transpose fused with the bf16 cast (interface boundary only).
    x = jnp.transpose(x_nchw, (0, 2, 3, 1)).astype(jnp.bfloat16)          # (N,H,W,C0)

    # Block-input per-channel batch stats in one fused pass (mean & mean-of-squares).
    x32 = x.astype(jnp.float32)
    stats0 = jnp.mean(jnp.stack([x32, x32 * x32], axis=0), axis=(1, 2, 3))  # (2, C0)
    mean_c, msq_c = stats0[0], stats0[1]

    denom = float(N * H * W)
    for p in params:
        Cin = x.shape[-1]
        Cmid = p["w1"].shape[0]
        G = p["w2"].shape[0]

        # --- BN1 (cached stats) -> ReLU -> 1x1 conv ---
        scale1, bias1 = _fold_bn(p["gamma1"], p["beta1"], mean_c, msq_c, eps)
        w1 = jnp.transpose(p["w1"][:, :, 0, 0], (1, 0)).astype(jnp.bfloat16)  # (Cin,Cmid)
        th = _pick_th(H, W, Cin, Cmid, N, budget_bytes=max(vmem_cap // 4, 4 * 2**20))
        z, s1, ss1 = _stage1(x, scale1, bias1, w1, th, vmem_cap)

        # --- BN2 (stats from stage-1 partial sums) -> ReLU -> 3x3 conv ---
        mean2 = jnp.sum(s1, axis=(0, 1, 2)) / denom
        msq2 = jnp.sum(ss1, axis=(0, 1, 2)) / denom
        scale2, bias2 = _fold_bn(p["gamma2"], p["beta2"], mean2, msq2, eps)
        w2r = jnp.transpose(p["w2"], (2, 3, 1, 0)).reshape(9, Cmid, G).astype(jnp.bfloat16)
        g, sg, ssg = _stage2(z, scale2, bias2, w2r, vmem_cap)

        # --- dense connectivity + stat cache for the new channels ---
        x = jnp.concatenate([x, g], axis=-1)
        mean_c = jnp.concatenate([mean_c, jnp.sum(sg, axis=(0, 1)) / denom])
        msq_c = jnp.concatenate([msq_c, jnp.sum(ssg, axis=(0, 1)) / denom])

    return jnp.transpose(x, (0, 3, 1, 2)).astype(jnp.float32)             # NHWC->NCHW


# --------------------------------------------------------------------------- reference
def _dense_block_ref(x, params, eps=_EPS):
    def bn(v, gamma, beta):
        mean = v.mean(axis=(0, 2, 3), keepdims=True)
        var = ((v - mean) ** 2).mean(axis=(0, 2, 3), keepdims=True)
        return ((v - mean) / jnp.sqrt(var + eps) * gamma[None, :, None, None]
                + beta[None, :, None, None])

    for p in params:
        y = jnp.maximum(bn(x, p["gamma1"], p["beta1"]), 0.0)
        z = jnp.einsum('nchw,oc->nohw', y, p["w1"][:, :, 0, 0])
        y2 = jnp.maximum(bn(z, p["gamma2"], p["beta2"]), 0.0)
        g = lax.conv_general_dilated(y2, p["w2"], window_strides=(1, 1),
                                     padding="SAME",
                                     dimension_numbers=("NCHW", "OIHW", "NCHW"))
        x = jnp.concatenate([x, g], axis=1)
    return x


if __name__ == "__main__":
    key = jax.random.PRNGKey(0)
    N, in_dim, H, W = 2, 4, 16, 16
    growth, n_blocks = 4, 2
    mid = 4 * growth

    keys = jax.random.split(key, 1 + 6 * n_blocks)
    x = jax.random.normal(keys[0], (N, in_dim, H, W), dtype=jnp.float32)

    params = []
    c = in_dim
    for i in range(n_blocks):
        k = keys[1 + 6 * i: 1 + 6 * (i + 1)]
        params.append(dict(
            gamma1=1.0 + 0.1 * jax.random.normal(k[0], (c,), jnp.float32),
            beta1=0.1 * jax.random.normal(k[1], (c,), jnp.float32),
            w1=0.1 * jax.random.normal(k[2], (mid, c, 1, 1), jnp.float32),
            gamma2=1.0 + 0.1 * jax.random.normal(k[3], (mid,), jnp.float32),
            beta2=0.1 * jax.random.normal(k[4], (mid,), jnp.float32),
            w2=0.05 * jax.random.normal(k[5], (growth, mid, 3, 3), jnp.float32),
        ))
        c += growth

    out = jax.block_until_ready(dense_block_forward(x, params))
    ref = _dense_block_ref(x, params)

    assert out.shape == (N, in_dim + n_blocks * growth, H, W), out.shape
    err = float(jnp.max(jnp.abs(out - ref)))
    # bf16 activations + bf16 MXU operands end-to-end vs a pure-f32 reference.
    assert err < 1e-1, err
    print("KERNEL_OK")
</pallas_src>

<mosaic_0001>
module attributes {stable_mosaic.version = 11 : i64} {
  func.func @_stage1_kernel(%arg0: i32, %arg1: i32, %arg2: memref<1x16x16x4xbf16, #tpu.memory_space<vmem>>, %arg3: memref<1x4xf32, #tpu.memory_space<vmem>>, %arg4: memref<1x4xf32, #tpu.memory_space<vmem>>, %arg5: memref<4x16xbf16, #tpu.memory_space<vmem>>, %arg6: memref<1x16x16x16xbf16, #tpu.memory_space<vmem>>, %arg7: memref<1x1x1x16xf32, #tpu.memory_space<vmem>>, %arg8: memref<1x1x1x16xf32, #tpu.memory_space<vmem>>) attributes {dimension_semantics = [#tpu.dimension_semantics<parallel>, #tpu.dimension_semantics<parallel>], iteration_bounds = array<i64: 2, 1>, scalar_prefetch = 0 : i64, scratch_operands = 0 : i64, tpu.core_type = #tpu.core_type<tc>, window_params = [{transform_indices = @transform_0, window_bounds = array<i64: 1, 16, 16, 4>}, {pipeline_mode = #tpu.pipeline_mode<synchronous>, transform_indices = @transform_1, window_bounds = array<i64: 1, 4>}, {pipeline_mode = #tpu.pipeline_mode<synchronous>, transform_indices = @transform_2, window_bounds = array<i64: 1, 4>}, {pipeline_mode = #tpu.pipeline_mode<synchronous>, transform_indices = @transform_3, window_bounds = array<i64: 4, 16>}, {transform_indices = @transform_4, window_bounds = array<i64: 1, 16, 16, 16>}, {transform_indices = @transform_5, window_bounds = array<i64: 1, 1, 1, 16>}, {transform_indices = @transform_6, window_bounds = array<i64: 1, 1, 1, 16>}]} {
    %c0 = arith.constant 0 : index
    %c0_0 = arith.constant 0 : index
    %c0_1 = arith.constant 0 : index
    %c0_2 = arith.constant 0 : index
    %0 = vector.load %arg2[%c0, %c0_0, %c0_1, %c0_2] : memref<1x16x16x4xbf16, #tpu.memory_space<vmem>>, vector<1x16x16x4xbf16>
    %1 = vector.shape_cast %0 : vector<1x16x16x4xbf16> to vector<16x16x4xbf16>
    %2 = arith.extf %1 : vector<16x16x4xbf16> to vector<16x16x4xf32>
    %c0_3 = arith.constant 0 : index
    %c0_4 = arith.constant 0 : index
    %3 = vector.load %arg3[%c0_3, %c0_4] : memref<1x4xf32, #tpu.memory_space<vmem>>, vector<1x4xf32>
    %4 = vector.shape_cast %3 : vector<1x4xf32> to vector<4xf32>
    %5 = vector.shape_cast %4 : vector<4xf32> to vector<1x1x4xf32>
    %6 = vector.broadcast %5 : vector<1x1x4xf32> to vector<16x16x4xf32>
    %7 = arith.mulf %2, %6 : vector<16x16x4xf32>
    %c0_5 = arith.constant 0 : index
    %c0_6 = arith.constant 0 : index
    %8 = vector.load %arg4[%c0_5, %c0_6] : memref<1x4xf32, #tpu.memory_space<vmem>>, vector<1x4xf32>
    %9 = vector.shape_cast %8 : vector<1x4xf32> to vector<4xf32>
    %10 = vector.shape_cast %9 : vector<4xf32> to vector<1x1x4xf32>
    %11 = vector.broadcast %10 : vector<1x1x4xf32> to vector<16x16x4xf32>
    %12 = arith.addf %7, %11 : vector<16x16x4xf32>
    %cst = arith.constant 0.000000e+00 : f32
    %13 = vector.broadcast %cst : f32 to vector<16x16x4xf32>
    %14 = arith.maximumf %12, %13 : vector<16x16x4xf32>
    %15 = arith.truncf %14 : vector<16x16x4xf32> to vector<16x16x4xbf16>
    %16 = vector.shape_cast %15 : vector<16x16x4xbf16> to vector<256x4xbf16>
    %c0_7 = arith.constant 0 : index
    %c0_8 = arith.constant 0 : index
    %17 = vector.load %arg5[%c0_7, %c0_8] : memref<4x16xbf16, #tpu.memory_space<vmem>>, vector<4x16xbf16>
    %cst_9 = arith.constant dense<0.000000e+00> : vector<256x16xf32>
    %18 = tpu.matmul %16, %17, %cst_9 {dimension_numbers = #tpu.dot_dimension_numbers<[1], [0], [0], [1], [0, 0, 1, 1], [], []>} : vector<256x4xbf16>, vector<4x16xbf16>, vector<256x16xf32> -> vector<256x16xf32>
    %19 = vector.shape_cast %18 : vector<256x16xf32> to vector<16x16x16xf32>
    %20 = arith.truncf %19 : vector<16x16x16xf32> to vector<16x16x16xbf16>
    %c0_10 = arith.constant 0 : index
    %c0_11 = arith.constant 0 : index
    %c0_12 = arith.constant 0 : index
    %c0_13 = arith.constant 0 : index
    %21 = vector.load %arg6[%c0_10, %c0_11, %c0_12, %c0_13] : memref<1x16x16x16xbf16, #tpu.memory_space<vmem>>, vector<1x16x16x16xbf16>
    %22 = vector.shape_cast %21 : vector<1x16x16x16xbf16> to vector<16x16x16xbf16>
    %23 = vector.shape_cast %20 : vector<16x16x16xbf16> to vector<1x16x16x16xbf16>
    tpu.vector_store %arg6[%c0_10, %c0_11, %c0_12, %c0_13], %23 {strides = array<i32>} : memref<1x16x16x16xbf16, #tpu.memory_space<vmem>>, vector<1x16x16x16xbf16>,
    %cst_14 = arith.constant dense<0.000000e+00> : vector<16xf32>
    %24 = vector.multi_reduction <add>, %18, %cst_14 [0] : vector<256x16xf32> to vector<16xf32>
    %25 = vector.shape_cast %24 : vector<16xf32> to vector<1x16xf32>
    %c0_15 = arith.constant 0 : index
    %c0_16 = arith.constant 0 : index
    %c0_17 = arith.constant 0 : index
    %c0_18 = arith.constant 0 : index
    %26 = vector.load %arg7[%c0_15, %c0_16, %c0_17, %c0_18] : memref<1x1x1x16xf32, #tpu.memory_space<vmem>>, vector<1x1x1x16xf32>
    %27 = vector.shape_cast %26 : vector<1x1x1x16xf32> to vector<1x16xf32>
    %28 = vector.shape_cast %25 : vector<1x16xf32> to vector<1x1x1x16xf32>
    tpu.vector_store %arg7[%c0_15, %c0_16, %c0_17, %c0_18], %28 {strides = array<i32>} : memref<1x1x1x16xf32, #tpu.memory_space<vmem>>, vector<1x1x1x16xf32>,
    %29 = arith.mulf %18, %18 : vector<256x16xf32>
    %cst_19 = arith.constant dense<0.000000e+00> : vector<16xf32>
    %30 = vector.multi_reduction <add>, %29, %cst_19 [0] : vector<256x16xf32> to vector<16xf32>
    %31 = vector.shape_cast %30 : vector<16xf32> to vector<1x16xf32>
    %c0_20 = arith.constant 0 : index
    %c0_21 = arith.constant 0 : index
    %c0_22 = arith.constant 0 : index
    %c0_23 = arith.constant 0 : index
    %32 = vector.load %arg8[%c0_20, %c0_21, %c0_22, %c0_23] : memref<1x1x1x16xf32, #tpu.memory_space<vmem>>, vector<1x1x1x16xf32>
    %33 = vector.shape_cast %32 : vector<1x1x1x16xf32> to vector<1x16xf32>
    %34 = vector.shape_cast %31 : vector<1x16xf32> to vector<1x1x1x16xf32>
    tpu.vector_store %arg8[%c0_20, %c0_21, %c0_22, %c0_23], %34 {strides = array<i32>} : memref<1x1x1x16xf32, #tpu.memory_space<vmem>>, vector<1x1x1x16xf32>,
    return
  }
  func.func @transform_0(%arg0: i32, %arg1: i32) -> (i32, i32, i32, i32) {
    %c0_i32 = arith.constant 0 : i32
    %c0_i32_0 = arith.constant 0 : i32
    %c0_i32_1 = arith.constant 0 : i32
    return %arg0, %arg1, %c0_i32, %c0_i32_0 : i32, i32, i32, i32
  }
  func.func @transform_1(%arg0: i32, %arg1: i32) -> (i32, i32) {
    %c0_i32 = arith.constant 0 : i32
    %c0_i32_0 = arith.constant 0 : i32
    %c0_i32_1 = arith.constant 0 : i32
    return %c0_i32, %c0_i32_0 : i32, i32
  }
  func.func @transform_2(%arg0: i32, %arg1: i32) -> (i32, i32) {
    %c0_i32 = arith.constant 0 : i32
    %c0_i32_0 = arith.constant 0 : i32
    %c0_i32_1 = arith.constant 0 : i32
    return %c0_i32, %c0_i32_0 : i32, i32
  }
  func.func @transform_3(%arg0: i32, %arg1: i32) -> (i32, i32) {
    %c0_i32 = arith.constant 0 : i32
    %c0_i32_0 = arith.constant 0 : i32
    %c0_i32_1 = arith.constant 0 : i32
    return %c0_i32, %c0_i32_0 : i32, i32
  }
  func.func @transform_4(%arg0: i32, %arg1: i32) -> (i32, i32, i32, i32) {
    %c0_i32 = arith.constant 0 : i32
    %c0_i32_0 = arith.constant 0 : i32
    %c0_i32_1 = arith.constant 0 : i32
    return %arg0, %arg1, %c0_i32, %c0_i32_0 : i32, i32, i32, i32
  }
  func.func @transform_5(%arg0: i32, %arg1: i32) -> (i32, i32, i32, i32) {
    %c0_i32 = arith.constant 0 : i32
    %c0_i32_0 = arith.constant 0 : i32
    %c0_i32_1 = arith.constant 0 : i32
    return %arg0, %arg1, %c0_i32, %c0_i32_0 : i32, i32, i32, i32
  }
  func.func @transform_6(%arg0: i32, %arg1: i32) -> (i32, i32, i32, i32) {
    %c0_i32 = arith.constant 0 : i32
    %c0_i32_0 = arith.constant 0 : i32
    %c0_i32_1 = arith.constant 0 : i32
    return %arg0, %arg1, %c0_i32, %c0_i32_0 : i32, i32, i32, i32
  }
}

</mosaic_0001>

<bundles_post_ra>
// kernel: tpu_custom_call.1
= control target key start
LH: loop header
LB: loop body
LE: loop exit
PB: predicated region body
PF: predicated region fallthrough
CT: control target
= control target key end

     0   :  { %12 = vsyncpa [#allocation3], 0  ;;  %s2266_s0 = inlined_call_operand.vmem [shape: bf16[2,16,16,4], index: 0, kind: input, shape index: {}]   ;;  %s2267_s1 = inlined_call_operand.vmem [shape: f32[1,4], index: 1, kind: input, shape index: {}]   ;;  %s2268_s2 = inlined_call_operand.vmem [shape: f32[1,4], index: 2, kind: input, shape index: {}]   ;;  %s2269_s3 = inlined_call_operand.vmem [shape: bf16[4,16], index: 3, kind: input, shape index: {}]   ;;  %s2270_s4 = inlined_call_operand.hbm [shape: bf16[2,16,16,16], index: 4, kind: output, shape index: {0}]   ;;  %s2271_s5 = inlined_call_operand.hbm [shape: f32[2,1,1,16], index: 5, kind: output, shape index: {1}]   ;;  %s2272_s6 = inlined_call_operand.hbm [shape: f32[2,1,1,16], index: 6, kind: output, shape index: {2}]  }
   0x1   :  { %14 = vsyncpa [#allocation3 + $0x1], 0 }
   0x2   :  { %15 = vsyncpa [#allocation5], 0 }
   0x3   :  { %17 = vsyncpa [#allocation5 + $0x1], 0  ;;  %s1709_s21 = smov 0   ;;  %s1711_s22 = smov 0  }
   0x4   :  { %s1713_s23 = smov 0   ;;  %s1715_s24 = smov 0  }
   0x5   :  { %s1717_s25 = smov 0   ;;  %s1719_s26 = smov 0  }
   0x6 LB: > { %s1235_s27 = sadd.s32 4294967295, %s1667_s26   ;;  %s2273_s28 = sadd.s32 4294967294, %s1667_s26   ;;  %s1667_s26 = sphi %s1719_s26, %s23_s26   ;;  %s1663_s25 = sphi %s1717_s25, %s2284_s25   ;;  %s1659_s24 = sphi %s1715_s24, %s2283_s24   ;;  %s1655_s23 = sphi %s1713_s23, %s2282_s23   ;;  %s1651_s22 = sphi %s1711_s22, %s2281_s22   ;;  %s1647_s21 = sphi %s1709_s21, %s2280_s21  }
   0x7   : > { %s35_s29 = sadd.s32 1, %s1663_s25  ;;  %s135_s30 = sadd.s32 1, %s1655_s23 }
   0x8   : > { %p37_p0 = scmp.ge.s32.totalorder %s35_s29, 2  ;;  %p145_p1 = scmp.ne.s32.totalorder %s1655_s23, %s1651_s22 }
   0x9   : > { %p146_p2 = scmp.eq.s32.totalorder %s1235_s27, 1  ;;  %p151_p3 = scmp.ne.s32.totalorder %s1651_s22, %s1647_s21 }
   0xa   : > { %s2286_s29 = smov (%p37_p0, %s35_s29), 0  ;;  %p152_p5 = scmp.eq.s32.totalorder %s2273_s28, 1 }
   0xb   : > { %p1751_p4 = por %p146_p2, %p145_p1  ;;  %s130_s8 = ssub.s32 %s1663_s25, %s2286_s29 }
   0xc   : > { %p1239_p6 = scmp.ge.s32.totalorder %s1667_s26, 1  ;;  %p133_p7 = scmp.eq.s32.totalorder %s130_s8, 0 }
   0xd   : > { %p1760_p8 = por %p152_p5, %p151_p3  ;;  %p249_p9 = scmp.lt.s32.totalorder %s1667_s26, 3 }
   0xe   : > { %s1766_s10 = scalar_select %p133_p7, %s1655_s23, %s135_s30  }
   0xf   : > { %p250_p10 = pnand %p1239_p6, %p249_p9 }
  0x10   : > { %p293_p11 = scmp.lt.s32.totalorder (!%p250_p10), %s1659_s24, 1  ;;  %s1893_s8 = sand.u32 (!%p250_p10), 1, %s1651_s22  }
  0x11   : > { %253 = sbr.rel (%p250_p10) target bundleno = 357 (0x165), region = 36  ;;  %s1240_s11 = sshll.u32 (!%p250_p10), %s1893_s8, 7 }
  0x12   : > { %s1896_s12 = scalar_lea.vmem (!%p250_p10), [#allocation2], %s1240_s11  ;;  %s1046_s18 = scalar_lea.sflag (!%p250_p10), [#allocation3], %s1893_s8 }
  0x13   : > { %s1669_s20 = smov (!%p250_p10), [#allocation2]  }
  0x14   : > { %s1539_s30 = sshll.u32 (!%p250_p10), %s1669_s20, 4  ;;  %s1540_s30 = int_to_ptr.vmem [resolvable:$false] %s1539_s30 }
  0x15   : > { %s1541_s11 = scalar_lea.vmem (!%p250_p10), %s1540_s30, 4096 }
  0x16   : > { %v495_v0 = vld [vmem:[%s2269_s3] sm:$0x3]  ;;  %vm545_vm0 = vcmask 1041408   ;;  %s294_s13 = scalar_select %p293_p11, %s1659_s24, 1  ;;  %vm496_vm1 = vcmask 31744   ;;  %vm838_vm2 = vcmask 125952  }
  0x17   : > { %1466 = vmatprep.subr.msk.bf16.mxu0 %vm545_vm0, %v495_v0  ;;  %v547_v1 = vsel %vm545_vm0, %v495_v0, 0  ;;  %1467 = vmatprep.subr.msk.bf16.mxu1 %vm545_vm0, %v495_v0  ;;  %v1781_v2 = vld [vmem:[%s2267_s1] ss:$0 sm:$0xff]  ;;  %vm871_vm3 = vcmask 130048  }
  0x18   : > { %1431 = vmatpush3.bf16.msra.mxu0 %v547_v1  ;;  %1465 = vmatpush3.bf16.msra.mxu1 %v547_v1  ;;  %s1300_s14 = sshll.u32 %s294_s13, 7  ;;  %v1790_v11 = vld [vmem:[%s2268_s2] ss:$0 sm:$0xff]  ;;  %s1333_s13 = sshll.u32 %s1659_s24, 11 }
  0x19   : > { %s1776_s17 = scalar_lea.vmem %s2266_s0, %s1300_s14  ;;  %s1070_s14 = sshll.u32 %s1896_s12, 4  ;;  %s2090_s14 = int_to_ptr.vmem [resolvable:$true] %s1070_s14 }
  0x1a   : > { %v1335_v3 = vld [vmem:[%s1776_s17] sm:$0xff]   ;;  %v1398_v4 = vld [vmem:[%s1776_s17 + $0x8] sm:$0xff]   ;;  %v1399_v5 = vld [vmem:[%s1776_s17 + $0x10] sm:$0xff]   ;;  %s1535_s19 = scalar_lea.vmem %s2090_s14, 2048  ;;  %p1542_p1 = scmp.lt.s32.totalorder %s2090_s14, %s1540_s30 }
  0x1b   : > { %v1336_v6 = vunpack.c.l.bf16 %v1335_v3  ;;  %v1337_v7 = vunpack.c.h.bf16 %v1335_v3  ;;  %v1340_v8 = vunpack.c.l.bf16 %v1398_v4  ;;  %v1341_v9 = vunpack.c.h.bf16 %v1398_v4  ;;  %v1400_v10 = vld [vmem:[%s1776_s17 + $0x18] sm:$0xff]   ;;  %v1401_v32 = vld [vmem:[%s1776_s17 + $0x20] sm:$0xff]   ;;  %v1402_v37 = vld [vmem:[%s1776_s17 + $0x28] sm:$0xff]   ;;  %p1536_p12 = scmp.ne.s32.totalorder %s2090_s14, %s1535_s19  ;;  %p1543_p2 = scmp.lt.s32.totalorder %s1541_s11, %s1535_s19 }
  0x1c   : > { %v1344_v12 = vunpack.c.l.bf16 %v1399_v5  ;;  %v1345_v13 = vunpack.c.h.bf16 %v1399_v5  ;;  %v1348_v14 = vunpack.c.l.bf16 %v1400_v10  ;;  %v1349_v15 = vunpack.c.h.bf16 %v1400_v10  ;;  %v1403_v42 = vld [vmem:[%s1776_s17 + $0x30] sm:$0xff]   ;;  %v1404_v47 = vld [vmem:[%s1776_s17 + $0x38] sm:$0xff]   ;;  %v1405_v5 = vld [vmem:[%s1776_s17 + $0x40] sm:$0xff]  }
  0x1d   : > { %v376_v16 = vmul.f32 %v1336_v6, %v1781_v2  ;;  %v377_v17 = vmul.f32 %v1337_v7, %v1781_v2  ;;  %v378_v18 = vmul.f32 %v1340_v8, %v1781_v2  ;;  %v379_v19 = vmul.f32 %v1341_v9, %v1781_v2  ;;  %p1537_p13 = pnand %p1536_p12, %p1751_p4  ;;  %p1544_p3 = por %p1543_p2, %p1542_p1 }
  0x1e   : > { %v380_v20 = vmul.f32 %v1344_v12, %v1781_v2  ;;  %v381_v21 = vmul.f32 %v1345_v13, %v1781_v2  ;;  %v382_v22 = vmul.f32 %v1348_v14, %v1781_v2  ;;  %v383_v23 = vmul.f32 %v1349_v15, %v1781_v2  ;;  %v1406_v15 = vld [vmem:[%s1776_s17 + $0x48] sm:$0xff]  }
  0x1f   : > { %v415_v24 = vadd.f32 %v1790_v11, %v376_v16  ;;  %v416_v25 = vadd.f32 %v1790_v11, %v377_v17  ;;  %v417_v26 = vadd.f32 %v1790_v11, %v378_v18  ;;  %v418_v27 = vadd.f32 %v1790_v11, %v379_v19  ;;  %p1538_p0 = pneg %p1537_p13 }
  0x20   : > { %v419_v28 = vadd.f32 %v1790_v11, %v380_v20  ;;  %v420_v29 = vadd.f32 %v1790_v11, %v381_v21  ;;  %v421_v30 = vadd.f32 %v1790_v11, %v382_v22  ;;  %v422_v31 = vadd.f32 %v1790_v11, %v383_v23  ;;  %v1407_v20 = vld [vmem:[%s1776_s17 + $0x50] sm:$0xff]  }
  0x21   : > { %v447_v33 = vmax.f32 %v415_v24, 0.0  ;;  %v448_v34 = vmax.f32 %v416_v25, 0.0  ;;  %v449_v35 = vmax.f32 %v417_v26, 0.0  ;;  %v450_v36 = vmax.f32 %v418_v27, 0.0  ;;  %v1408_v24 = vld [vmem:[%s1776_s17 + $0x58] sm:$0xff]   ;;  %p1545_p5 = pnand %p1544_p3, %p1538_p0 }
  0x22   : > { %v451_v38 = vmax.f32 %v419_v28, 0.0  ;;  %v452_v39 = vmax.f32 %v420_v29, 0.0  ;;  %v453_v40 = vmax.f32 %v421_v30, 0.0  ;;  %v454_v41 = vmax.f32 %v422_v31, 0.0 }
  0x23   : > { %v479_v43 = vpack.c.bf16 %v448_v34, %v447_v33  ;;  %v480_v44 = vpack.c.bf16 %v450_v36, %v449_v35  ;;  %v1352_v45 = vunpack.c.l.bf16 %v1401_v32  ;;  %v1353_v46 = vunpack.c.h.bf16 %v1401_v32 }
  0x24   : > { %v481_v48 = vpack.c.bf16 %v452_v39, %v451_v38  ;;  %v482_v49 = vpack.c.bf16 %v454_v41, %v453_v40  ;;  %v1356_v50 = vunpack.c.l.bf16 %v1402_v37  ;;  %v1357_v51 = vunpack.c.h.bf16 %v1402_v37  ;;  %v1409_v41 = vld [vmem:[%s1776_s17 + $0x60] sm:$0xff]  }
  0x25   : > { %1432 = vmatprep.mubr.msk.bf16.mxu0 %vm496_vm1, %v479_v43  ;;  %v384_v52 = vmul.f32 %v1352_v45, %v1781_v2  ;;  %v385_v53 = vmul.f32 %v1353_v46, %v1781_v2  ;;  %v1360_v54 = vunpack.c.l.bf16 %v1403_v42  ;;  %v1361_v55 = vunpack.c.h.bf16 %v1403_v42 }
  0x26   : > { %1433 = vmatmul.mubr.msk.bf16.vlgmr.msra.gmra.mxu0 %vm496_vm1, %v480_v44  ;;  %v386_v56 = vmul.f32 %v1356_v50, %v1781_v2  ;;  %v387_v57 = vmul.f32 %v1357_v51, %v1781_v2  ;;  %v1364_v58 = vunpack.c.l.bf16 %v1404_v47  ;;  %v1365_v59 = vunpack.c.h.bf16 %v1404_v47 }
  0x27   : > { %1436 = vmatprep.mubr.msk.bf16.mxu0 %vm496_vm1, %v481_v48  ;;  %v423_v60 = vadd.f32 %v1790_v11, %v384_v52  ;;  %v424_v61 = vadd.f32 %v1790_v11, %v385_v53  ;;  %v388_v62 = vmul.f32 %v1360_v54, %v1781_v2  ;;  %v389_v63 = vmul.f32 %v1361_v55, %v1781_v2  ;;  %v1410_v54 = vld [vmem:[%s1776_s17 + $0x68] sm:$0xff]  }
  0x28   : > { %v425_v0 = vadd.f32 %v1790_v11, %v386_v56  ;;  %v426_v1 = vadd.f32 %v1790_v11, %v387_v57  ;;  %v390_v3 = vmul.f32 %v1364_v58, %v1781_v2  ;;  %v391_v4 = vmul.f32 %v1365_v59, %v1781_v2  ;;  %v1411_v59 = vld [vmem:[%s1776_s17 + $0x70] sm:$0xff]  }
  0x29   : > { %v455_v6 = vmax.f32 %v423_v60, 0.0  ;;  %v456_v7 = vmax.f32 %v424_v61, 0.0  ;;  %v427_v8 = vadd.f32 %v1790_v11, %v388_v62  ;;  %v428_v9 = vadd.f32 %v1790_v11, %v389_v63 }
  0x2a   : > { %v457_v10 = vmax.f32 %v425_v0, 0.0  ;;  %v458_v12 = vmax.f32 %v426_v1, 0.0  ;;  %v1831_v13 = vadd.f32 %v1790_v11, %v390_v3  ;;  %v1834_v14 = vadd.f32 %v1790_v11, %v391_v4 }
  0x2b   : > { %v483_v16 = vpack.c.bf16 %v456_v7, %v455_v6  ;;  %v459_v17 = vmax.f32 %v427_v8, 0.0  ;;  %v460_v18 = vmax.f32 %v428_v9, 0.0  ;;  %v1368_v19 = vunpack.c.l.bf16 %v1405_v5  ;;  %v1412_v9 = vld [vmem:[%s1776_s17 + $0x78] sm:$0xff]   ;;  %s2088_s17 = scalar_lea.hbm %s2270_s4, %s1333_s13 }
  0x2c   : > { %v484_v21 = vpack.c.bf16 %v458_v12, %v457_v10  ;;  %v461_v22 = vmax.f32 %v1831_v13, 0.0  ;;  %v1369_v23 = vunpack.c.h.bf16 %v1405_v5  ;;  %v462_v25 = vmax.f32 %v1834_v14, 0.0 }
  0x2d   : > { %v392_v26 = vmul.f32 %v1368_v19, %v1781_v2  ;;  %v1372_v27 = vunpack.c.l.bf16 %v1406_v15  ;;  %v1373_v28 = vunpack.c.h.bf16 %v1406_v15  ;;  %v485_v29 = vpack.c.bf16 %v460_v18, %v459_v17 }
  0x2e   : > { %1437 = vmatmul.mubr.msk.bf16.gmra.mxu0 %vm496_vm1, %v482_v49  ;;  %v393_v30 = vmul.f32 %v1369_v23, %v1781_v2  ;;  %v1376_v31 = vunpack.c.l.bf16 %v1407_v20  ;;  %v1377_v32 = vunpack.c.h.bf16 %v1407_v20  ;;  %v1380_v36 = vunpack.c.l.bf16 %v1408_v24 }
  0x2f   : > { %1440 = vmatprep.mubr.msk.bf16.mxu0 %vm496_vm1, %v483_v16  ;;  %v431_v33 = vadd.f32 %v1790_v11, %v392_v26  ;;  %v394_v34 = vmul.f32 %v1372_v27, %v1781_v2  ;;  %v395_v35 = vmul.f32 %v1373_v28, %v1781_v2  ;;  %v1381_v40 = vunpack.c.h.bf16 %v1408_v24 }
  0x30   : > { %v432_v37 = vadd.f32 %v1790_v11, %v393_v30  ;;  %v396_v38 = vmul.f32 %v1376_v31, %v1781_v2  ;;  %v397_v39 = vmul.f32 %v1377_v32, %v1781_v2  ;;  %v398_v45 = vmul.f32 %v1380_v36, %v1781_v2 }
  0x31   : > { %v463_v42 = vmax.f32 %v431_v33, 0.0  ;;  %v433_v43 = vadd.f32 %v1790_v11, %v394_v34  ;;  %v434_v44 = vadd.f32 %v1790_v11, %v395_v35  ;;  %v399_v49 = vmul.f32 %v1381_v40, %v1781_v2 }
  0x32   : > { %v464_v46 = vmax.f32 %v432_v37, 0.0  ;;  %v435_v47 = vadd.f32 %v1790_v11, %v396_v38  ;;  %v436_v48 = vadd.f32 %v1790_v11, %v397_v39  ;;  %v437_v52 = vadd.f32 %v1790_v11, %v398_v45 }
  0x33   : > { %v465_v50 = vmax.f32 %v433_v43, 0.0  ;;  %v466_v51 = vmax.f32 %v434_v44, 0.0  ;;  %v1384_v53 = vunpack.c.l.bf16 %v1409_v41  ;;  %v438_v58 = vadd.f32 %v1790_v11, %v399_v49 }
  0x34   : > { %v487_v55 = vpack.c.bf16 %v464_v46, %v463_v42  ;;  %v467_v56 = vmax.f32 %v435_v47, 0.0  ;;  %v468_v57 = vmax.f32 %v436_v48, 0.0  ;;  %v469_v61 = vmax.f32 %v437_v52, 0.0 }
  0x35   : > { %v488_v60 = vpack.c.bf16 %v466_v51, %v465_v50  ;;  %v1385_v62 = vunpack.c.h.bf16 %v1409_v41  ;;  %v400_v63 = vmul.f32 %v1384_v53, %v1781_v2  ;;  %v470_v1 = vmax.f32 %v438_v58, 0.0 }
  0x36   : > { %1441 = vmatmul.mubr.msk.bf16.gmra.mxu0 %vm496_vm1, %v484_v21  ;;  %1448 = vmatprep.mubr.msk.bf16.mxu1 %vm496_vm1, %v487_v55  ;;  %v489_v0 = vpack.c.bf16 %v468_v57, %v467_v56  ;;  %v1388_v3 = vunpack.c.l.bf16 %v1410_v54  ;;  %v1389_v4 = vunpack.c.h.bf16 %v1410_v54  ;;  %v1392_v7 = vunpack.c.l.bf16 %v1411_v59 }
  0x37   : > { %1444 = vmatprep.mubr.msk.bf16.mxu0 %vm496_vm1, %v485_v29  ;;  %1449 = vmatmul.mubr.msk.bf16.vlgmr.msra.gmra.mxu1 %vm496_vm1, %v488_v60  ;;  %v401_v5 = vmul.f32 %v1385_v62, %v1781_v2  ;;  %v439_v6 = vadd.f32 %v1790_v11, %v400_v63  ;;  %v1393_v8 = vunpack.c.h.bf16 %v1411_v59  ;;  %v486_v18 = vpack.c.bf16 %v462_v25, %v461_v22 }
  0x38   : > { %1452 = vmatprep.mubr.msk.bf16.mxu1 %vm496_vm1, %v489_v0  ;;  %v402_v10 = vmul.f32 %v1388_v3, %v1781_v2  ;;  %v403_v12 = vmul.f32 %v1389_v4, %v1781_v2  ;;  %v404_v16 = vmul.f32 %v1392_v7, %v1781_v2  ;;  %v490_v19 = vpack.c.bf16 %v470_v1, %v469_v61 }
  0x39   : > { %v440_v14 = vadd.f32 %v1790_v11, %v401_v5  ;;  %v471_v15 = vmax.f32 %v439_v6, 0.0  ;;  %v405_v17 = vmul.f32 %v1393_v8, %v1781_v2  ;;  %v1396_v20 = vunpack.c.l.bf16 %v1412_v9 }
  0x3a   : > { %v441_v23 = vadd.f32 %v1790_v11, %v402_v10  ;;  %v442_v24 = vadd.f32 %v1790_v11, %v403_v12  ;;  %v1397_v26 = vunpack.c.h.bf16 %v1412_v9  ;;  %v443_v27 = vadd.f32 %v1790_v11, %v404_v16 }
  0x3b   : > { %v472_v21 = vmax.f32 %v440_v14, 0.0  ;;  %v444_v28 = vadd.f32 %v1790_v11, %v405_v17  ;;  %v406_v22 = vmul.f32 %v1396_v20, %v1781_v2 }
  0x3c   : > { %v473_v30 = vmax.f32 %v441_v23, 0.0  ;;  %v474_v13 = vmax.f32 %v442_v24, 0.0  ;;  %v407_v25 = vmul.f32 %v1397_v26, %v1781_v2  ;;  %v475_v31 = vmax.f32 %v443_v27, 0.0 }
  0x3d   : > { %v491_v29 = vpack.c.bf16 %v472_v21, %v471_v15  ;;  %v476_v32 = vmax.f32 %v444_v28, 0.0  ;;  %v445_v34 = vadd.f32 %v1790_v11, %v406_v22 }
  0x3e   : > { %1445 = vmatmul.mubr.msk.bf16.gmra.mxu0 %vm496_vm1, %v486_v18  ;;  %v492_v33 = vpack.c.bf16 %v474_v13, %v473_v30  ;;  %v446_v35 = vadd.f32 %v1790_v11, %v407_v25 }
  0x3f   : > { %1453 = vmatmul.mubr.msk.bf16.gmra.mxu1 %vm496_vm1, %v490_v19  ;;  %v493_v36 = vpack.c.bf16 %v476_v32, %v475_v31  ;;  %v477_v37 = vmax.f32 %v445_v34, 0.0 }
  0x40   : > { %1456 = vmatprep.mubr.msk.bf16.mxu1 %vm496_vm1, %v491_v29  ;;  %v478_v38 = vmax.f32 %v446_v35, 0.0 }
  0x42   : > { %v494_v39 = vpack.c.bf16 %v478_v38, %v477_v37 }
  0x47   : > { %1457 = vmatmul.mubr.msk.bf16.gmra.mxu1 %vm496_vm1, %v492_v33 }
  0x48   : > { %1460 = vmatprep.mubr.msk.bf16.mxu1 %vm496_vm1, %v493_v36 }
  0x4f   : > { %1461 = vmatmul.mubr.msk.bf16.gmra.mxu1 %vm496_vm1, %v494_v39 }
  0xe6   : > { %v1434_v2 = vpop.f32.mrf.mxu0 }
  0xe7   : > { %v1303_v40 = vpack.c.bf16 %v1434_v2, %v1434_v2  ;;  %v945_v45 = vmul.f32 %v1434_v2, %v1434_v2  ;;  %v875_v51 = vsel %vm871_vm3, %v1434_v2, 0.0 }
  0xe8   : > { %v583_v41 = vpop.f32.mrf.mxu0 }
  0xe9   : > { %841 = vst.msk [vmem:[%s1896_s12 + $0x8] sm:$0xf] %vm838_vm2, %v1303_v40  ;;  %v1301_v11 = vpack.c.bf16 %v583_v41, %v583_v41  ;;  %v943_v43 = vmul.f32 %v583_v41, %v583_v41  ;;  %v872_v47 = vsel %vm871_vm3, %v583_v41, 0.0  ;;  %v978_v61 = vsel %vm871_vm3, %v945_v45, 0.0 }
  0xea   : > { %v1435_v42 = vpop.f32.mrf.mxu0 }
  0xeb   : > { %839 = vst.msk [vmem:[%s1896_s12] sm:$0xf] %vm838_vm2, %v1301_v11  ;;  %v1304_v44 = vpack.c.bf16 %v1435_v42, %v1435_v42  ;;  %v975_v54 = vsel %vm871_vm3, %v943_v43, 0.0  ;;  %v946_v55 = vmul.f32 %v1435_v42, %v1435_v42  ;;  %v877_v62 = vsel %vm871_vm3, %v1435_v42, 0.0 }
  0xec   : > { %v586_v46 = vpop.f32.mrf.mxu0 }
  0xed   : > { %842 = vst.msk [vmem:[%s1896_s12 + $0xc] sm:$0xf] %vm838_vm2, %v1304_v44  ;;  %v1302_v48 = vpack.c.bf16 %v586_v46, %v586_v46  ;;  %v873_v49 = vsel %vm871_vm3, %v586_v46, 0.0  ;;  %v944_v50 = vmul.f32 %v586_v46, %v586_v46  ;;  %v980_v5 = vsel %vm871_vm3, %v946_v55, 0.0 }
  0xee   : > { %v874_v52 = vadd.f32 %v873_v49, %v872_v47  ;;  %v1438_v53 = vpop.f32.mrf.mxu0 }
  0xef   : > { %840 = vst.msk [vmem:[%s1896_s12 + $0x4] sm:$0xf] %vm838_vm2, %v1302_v48  ;;  %v976_v56 = vsel %vm871_vm3, %v944_v50, 0.0  ;;  %v1307_v57 = vpack.c.bf16 %v1438_v53, %v1438_v53  ;;  %v949_v8 = vmul.f32 %v1438_v53, %v1438_v53  ;;  %v883_v21 = vsel %vm871_vm3, %v1438_v53, 0.0 }
  0xf0   : > { %v876_v58 = vadd.f32 %v875_v51, %v874_v52  ;;  %v977_v59 = vadd.f32 %v976_v56, %v975_v54  ;;  %v599_v60 = vpop.f32.mrf.mxu0 }
  0xf1   : > { %845 = vst.msk [vmem:[%s1896_s12 + $0x18] sm:$0xf] %vm838_vm2, %v1307_v57  ;;  %v1305_v63 = vpack.c.bf16 %v599_v60, %v599_v60  ;;  %v947_v0 = vmul.f32 %v599_v60, %v599_v60  ;;  %v879_v6 = vsel %vm871_vm3, %v599_v60, 0.0  ;;  %v986_v22 = vsel %vm871_vm3, %v949_v8, 0.0 }
  0xf2   : > { %v979_v1 = vadd.f32 %v978_v61, %v977_v59  ;;  %v878_v3 = vadd.f32 %v877_v62, %v876_v58  ;;  %v1439_v4 = vpop.f32.mrf.mxu0 }
  0xf3   : > { %843 = vst.msk [vmem:[%s1896_s12 + $0x10] sm:$0xf] %vm838_vm2, %v1305_v63  ;;  %v1308_v7 = vpack.c.bf16 %v1439_v4, %v1439_v4  ;;  %v982_v14 = vsel %vm871_vm3, %v947_v0, 0.0  ;;  %v950_v23 = vmul.f32 %v1439_v4, %v1439_v4  ;;  %v885_v25 = vsel %vm871_vm3, %v1439_v4, 0.0 }
  0xf4   : > { %v880_v9 = vadd.f32 %v879_v6, %v878_v3  ;;  %v981_v10 = vadd.f32 %v980_v5, %v979_v1  ;;  %v602_v12 = vpop.f32.mrf.mxu0 }
  0xf5   : > { %846 = vst.msk [vmem:[%s1896_s12 + $0x1c] sm:$0xf] %vm838_vm2, %v1308_v7  ;;  %v1306_v15 = vpack.c.bf16 %v602_v12, %v602_v12  ;;  %v881_v16 = vsel %vm871_vm3, %v602_v12, 0.0  ;;  %v948_v17 = vmul.f32 %v602_v12, %v602_v12  ;;  %v988_v38 = vsel %vm871_vm3, %v950_v23, 0.0 }
  0xf6   : > { %v983_v18 = vadd.f32 %v982_v14, %v981_v10  ;;  %v882_v19 = vadd.f32 %v881_v16, %v880_v9  ;;  %v1442_v20 = vpop.f32.mrf.mxu0 }
  0xf7   : > { %844 = vst.msk [vmem:[%s1896_s12 + $0x14] sm:$0xf] %vm838_vm2, %v1306_v15  ;;  %v984_v24 = vsel %vm871_vm3, %v948_v17, 0.0  ;;  %v1311_v26 = vpack.c.bf16 %v1442_v20, %v1442_v20  ;;  %v1927_v27 = vpop.f32.mrf.mxu1  ;;  %v953_v41 = vmul.f32 %v1442_v20, %v1442_v20  ;;  %v891_v53 = vsel %vm871_vm3, %v1442_v20, 0.0 }
  0xf8   : > { %v884_v28 = vadd.f32 %v883_v21, %v882_v19  ;;  %v985_v29 = vadd.f32 %v984_v24, %v983_v18  ;;  %v615_v30 = vpop.f32.mrf.mxu0  ;;  %v1319_v13 = vpack.c.bf16 %v1927_v27, %v1927_v27 }
  0xf9   : > { %849 = vst.msk [vmem:[%s1896_s12 + $0x28] sm:$0xf] %vm838_vm2, %v1311_v26  ;;  %v1309_v31 = vpack.c.bf16 %v615_v30, %v615_v30  ;;  %v951_v32 = vmul.f32 %v615_v30, %v615_v30  ;;  %v1935_v33 = vpop.f32.mrf.mxu1  ;;  %v887_v39 = vsel %vm871_vm3, %v615_v30, 0.0  ;;  %v994_v61 = vsel %vm871_vm3, %v953_v41, 0.0 }
  0xfa   : > { %v987_v34 = vadd.f32 %v986_v22, %v985_v29  ;;  %v886_v35 = vadd.f32 %v885_v25, %v884_v28  ;;  %v1443_v36 = vpop.f32.mrf.mxu0  ;;  %857 = vst.msk [vmem:[%s1896_s12 + $0x48] sm:$0xf] %vm838_vm2, %v1319_v13  ;;  %v1317_v37 = vpack.c.bf16 %v1935_v33, %v1935_v33 }
  0xfb   : > { %847 = vst.msk [vmem:[%s1896_s12 + $0x20] sm:$0xf] %vm838_vm2, %v1309_v31  ;;  %v1312_v2 = vpack.c.bf16 %v1443_v36, %v1443_v36  ;;  %v1945_v40 = vpop.f32.mrf.mxu1  ;;  %v990_v44 = vsel %vm871_vm3, %v951_v32, 0.0  ;;  %v954_v54 = vmul.f32 %v1443_v36, %v1443_v36  ;;  %v893_v62 = vsel %vm871_vm3, %v1443_v36, 0.0 }
  0xfc   : > { %v888_v11 = vadd.f32 %v887_v39, %v886_v35  ;;  %v989_v42 = vadd.f32 %v988_v38, %v987_v34  ;;  %v618_v43 = vpop.f32.mrf.mxu0  ;;  %855 = vst.msk [vmem:[%s1896_s12 + $0x40] sm:$0xf] %vm838_vm2, %v1317_v37  ;;  %v1320_v52 = vpack.c.bf16 %v1945_v40, %v1945_v40  ;;  %v959_v35 = vmul.f32 %v1935_v33, %v1935_v33 }
  0xfd   : > { %850 = vst.msk [vmem:[%s1896_s12 + $0x2c] sm:$0xf] %vm838_vm2, %v1312_v2  ;;  %v1310_v45 = vpack.c.bf16 %v618_v43, %v618_v43  ;;  %v889_v46 = vsel %vm871_vm3, %v618_v43, 0.0  ;;  %v952_v47 = vmul.f32 %v618_v43, %v618_v43  ;;  %v1953_v48 = vpop.f32.mrf.mxu1  ;;  %v996_v7 = vsel %vm871_vm3, %v954_v54, 0.0 }
  0xfe   : > { %v991_v49 = vadd.f32 %v990_v44, %v989_v42  ;;  %v890_v50 = vadd.f32 %v889_v46, %v888_v11  ;;  %v1446_v51 = vpop.f32.mrf.mxu0  ;;  %858 = vst.msk [vmem:[%s1896_s12 + $0x4c] sm:$0xf] %vm838_vm2, %v1320_v52  ;;  %v1318_v6 = vpack.c.bf16 %v1953_v48, %v1953_v48  ;;  %v903_v11 = vsel %vm871_vm3, %v1935_v33, 0.0 }
  0xff   : > { %848 = vst.msk [vmem:[%s1896_s12 + $0x24] sm:$0xf] %vm838_vm2, %v1310_v45  ;;  %v992_v55 = vsel %vm871_vm3, %v952_v47, 0.0  ;;  %v1315_v56 = vpack.c.bf16 %v1446_v51, %v1446_v51  ;;  %v1961_v57 = vpop.f32.mrf.mxu1  ;;  %v957_v12 = vmul.f32 %v1446_v51, %v1446_v51  ;;  %v899_v28 = vsel %vm871_vm3, %v1446_v51, 0.0 }
 0x100   : > { %v892_v58 = vadd.f32 %v891_v53, %v890_v50  ;;  %v993_v59 = vadd.f32 %v992_v55, %v991_v49  ;;  %v631_v60 = vpop.f32.mrf.mxu0  ;;  %856 = vst.msk [vmem:[%s1896_s12 + $0x44] sm:$0xf] %vm838_vm2, %v1318_v6  ;;  %v1323_v26 = vpack.c.bf16 %v1961_v57, %v1961_v57  ;;  %v960_v42 = vmul.f32 %v1953_v48, %v1953_v48 }
 0x101   : > { %853 = vst.msk [vmem:[%s1896_s12 + $0x38] sm:$0xf] %vm838_vm2, %v1315_v56  ;;  %v1313_v63 = vpack.c.bf16 %v631_v60, %v631_v60  ;;  %v955_v0 = vmul.f32 %v631_v60, %v631_v60  ;;  %v1969_v1 = vpop.f32.mrf.mxu1  ;;  %v895_v8 = vsel %vm871_vm3, %v631_v60, 0.0  ;;  %v1002_v32 = vsel %vm871_vm3, %v957_v12, 0.0 }
 0x102   : > { %v995_v3 = vadd.f32 %v994_v61, %v993_v59  ;;  %v894_v4 = vadd.f32 %v893_v62, %v892_v58  ;;  %v1447_v5 = vpop.f32.mrf.mxu0  ;;  %v1321_v13 = vpack.c.bf16 %v1969_v1, %v1969_v1  ;;  %861 = vst.msk [vmem:[%s1896_s12 + $0x58] sm:$0xf] %vm838_vm2, %v1323_v26  ;;  %v961_v47 = vmul.f32 %v1927_v27, %v1927_v27 }
 0x103   : > { %851 = vst.msk [vmem:[%s1896_s12 + $0x30] sm:$0xf] %vm838_vm2, %v1313_v63  ;;  %v1316_v9 = vpack.c.bf16 %v1447_v5, %v1447_v5  ;;  %v1977_v10 = vpop.f32.mrf.mxu1  ;;  %v998_v17 = vsel %vm871_vm3, %v955_v0, 0.0  ;;  %v958_v29 = vmul.f32 %v1447_v5, %v1447_v5  ;;  %v901_v34 = vsel %vm871_vm3, %v1447_v5, 0.0 }
 0x104   : > { %v896_v14 = vadd.f32 %v895_v8, %v894_v4  ;;  %v997_v15 = vadd.f32 %v996_v7, %v995_v3  ;;  %v634_v16 = vpop.f32.mrf.mxu0  ;;  %859 = vst.msk [vmem:[%s1896_s12 + $0x50] sm:$0xf] %vm838_vm2, %v1321_v13  ;;  %v1324_v36 = vpack.c.bf16 %v1977_v10, %v1977_v10  ;;  %v1006_v33 = vsel %vm871_vm3, %v959_v35, 0.0 }
 0x105   : > { %854 = vst.msk [vmem:[%s1896_s12 + $0x3c] sm:$0xf] %vm838_vm2, %v1316_v9  ;;  %v1314_v18 = vpack.c.bf16 %v634_v16, %v634_v16  ;;  %v897_v19 = vsel %vm871_vm3, %v634_v16, 0.0  ;;  %v956_v20 = vmul.f32 %v634_v16, %v634_v16  ;;  %v1985_v21 = vpop.f32.mrf.mxu1  ;;  %v1004_v41 = vsel %vm871_vm3, %v958_v29, 0.0 }
 0x106   : > { %v999_v23 = vadd.f32 %v998_v17, %v997_v15  ;;  %v898_v24 = vadd.f32 %v897_v19, %v896_v14  ;;  %v1322_v2 = vpack.c.bf16 %v1985_v21, %v1985_v21  ;;  %862 = vst.msk [vmem:[%s1896_s12 + $0x5c] sm:$0xf] %vm838_vm2, %v1324_v36  ;;  %v905_v49 = vsel %vm871_vm3, %v1953_v48, 0.0 }
 0x107   : > { %852 = vst.msk [vmem:[%s1896_s12 + $0x34] sm:$0xf] %vm838_vm2, %v1314_v18  ;;  %v1000_v30 = vsel %vm871_vm3, %v956_v20, 0.0  ;;  %v1995_v22 = vpop.f32.mrf.mxu1  ;;  %v907_v55 = vsel %vm871_vm3, %v1927_v27, 0.0  ;;  %v962_v56 = vmul.f32 %v1945_v40, %v1945_v40  ;;  %v1008_v48 = vsel %vm871_vm3, %v960_v42, 0.0 }
 0x108   : > { %v900_v25 = vadd.f32 %v899_v28, %v898_v24  ;;  %v1001_v31 = vadd.f32 %v1000_v30, %v999_v23  ;;  %v1327_v43 = vpack.c.bf16 %v1995_v22, %v1995_v22  ;;  %860 = vst.msk [vmem:[%s1896_s12 + $0x54] sm:$0xf] %vm838_vm2, %v1322_v2  ;;  %v1010_v27 = vsel %vm871_vm3, %v961_v47, 0.0 }
 0x109   : > { %v2007_v37 = vpop.f32.mrf.mxu1  ;;  %v909_v62 = vsel %vm871_vm3, %v1945_v40, 0.0  ;;  %v963_v63 = vmul.f32 %v1969_v1, %v1969_v1  ;;  %v1012_v40 = vsel %vm871_vm3, %v962_v56, 0.0  ;;  %v911_v7 = vsel %vm871_vm3, %v1969_v1, 0.0 }
 0x10a   : > { %v902_v38 = vadd.f32 %v901_v34, %v900_v25  ;;  %v1003_v39 = vadd.f32 %v1002_v32, %v1001_v31  ;;  %865 = vst.msk [vmem:[%s1896_s12 + $0x68] sm:$0xf] %vm838_vm2, %v1327_v43  ;;  %v1325_v50 = vpack.c.bf16 %v2007_v37, %v2007_v37  ;;  %v964_v8 = vmul.f32 %v1985_v21, %v1985_v21 }
 0x10b   : > { %v2020_v44 = vpop.f32.mrf.mxu1  ;;  %v965_v16 = vmul.f32 %v1961_v57, %v1961_v57  ;;  %v1014_v1 = vsel %vm871_vm3, %v963_v63, 0.0  ;;  %v913_v17 = vsel %vm871_vm3, %v1985_v21, 0.0  ;;  %v915_v23 = vsel %vm871_vm3, %v1961_v57, 0.0 }
 0x10c   : > { %v1005_v45 = vadd.f32 %v1004_v41, %v1003_v39  ;;  %v904_v46 = vadd.f32 %v903_v11, %v902_v38  ;;  %v1328_v54 = vpack.c.bf16 %v2020_v44, %v2020_v44  ;;  %863 = vst.msk [vmem:[%s1896_s12 + $0x60] sm:$0xf] %vm838_vm2, %v1325_v50  ;;  %v966_v24 = vmul.f32 %v1977_v10, %v1977_v10 }
 0x10d   : > { %v2033_v51 = vpop.f32.mrf.mxu1  ;;  %v1016_v26 = vsel %vm871_vm3, %v964_v8, 0.0  ;;  %v1018_v30 = vsel %vm871_vm3, %v965_v16, 0.0  ;;  %v917_v13 = vsel %vm871_vm3, %v1977_v10, 0.0  ;;  %v967_v25 = vmul.f32 %v2007_v37, %v2007_v37 }
 0x10e   : > { %v906_v52 = vadd.f32 %v905_v49, %v904_v46  ;;  %v1007_v53 = vadd.f32 %v1006_v33, %v1005_v45  ;;  %v1326_v58 = vpack.c.bf16 %v2033_v51, %v2033_v51  ;;  %866 = vst.msk [vmem:[%s1896_s12 + $0x6c] sm:$0xf] %vm838_vm2, %v1328_v54 }
 0x10f   : > { %v2046_v59 = vpop.f32.mrf.mxu1 }
 0x110   : > { %v908_v60 = vadd.f32 %v907_v55, %v906_v52  ;;  %v1009_v61 = vadd.f32 %v1008_v48, %v1007_v53  ;;  %864 = vst.msk [vmem:[%s1896_s12 + $0x64] sm:$0xf] %vm838_vm2, %v1326_v58  ;;  %v1331_v0 = vpack.c.bf16 %v2046_v59, %v2046_v59 }
 0x111   : > { %v2059_v3 = vpop.f32.mrf.mxu1 }
 0x112   : > { %v1011_v4 = vadd.f32 %v1010_v27, %v1009_v61  ;;  %v910_v5 = vadd.f32 %v909_v62, %v908_v60  ;;  %v1329_v6 = vpack.c.bf16 %v2059_v3, %v2059_v3  ;;  %869 = vst.msk [vmem:[%s1896_s12 + $0x78] sm:$0xf] %vm838_vm2, %v1331_v0 }
 0x113   : > { %v2072_v9 = vpop.f32.mrf.mxu1 }
 0x114   : > { %v912_v12 = vadd.f32 %v911_v7, %v910_v5  ;;  %v1013_v14 = vadd.f32 %v1012_v40, %v1011_v4  ;;  %867 = vst.msk [vmem:[%s1896_s12 + $0x70] sm:$0xf] %vm838_vm2, %v1329_v6  ;;  %v1332_v15 = vpack.c.bf16 %v2072_v9, %v2072_v9 }
 0x115   : > { %v2083_v18 = vpop.f32.mrf.mxu1 }
 0x116   : > { %v1015_v19 = vadd.f32 %v1014_v1, %v1013_v14  ;;  %v914_v20 = vadd.f32 %v913_v17, %v912_v12  ;;  %870 = vst.msk [vmem:[%s1896_s12 + $0x7c] sm:$0xf] %vm838_vm2, %v1332_v15  ;;  %v1330_v21 = vpack.c.bf16 %v2083_v18, %v2083_v18 }
 0x118   : > { %v916_v28 = vadd.f32 %v915_v23, %v914_v20  ;;  %v1017_v29 = vadd.f32 %v1016_v26, %v1015_v19  ;;  %868 = vst.msk [vmem:[%s1896_s12 + $0x74] sm:$0xf] %vm838_vm2, %v1330_v21 }
 0x119   : > { %1548 = shalt.err (!%p1545_p5)
}
 0x11a   : > { %s1549_s12 = scalar_lea.hbm %s2088_s17, 2048  ;;  %s1553_s16 = scalar_lea.hbm %s2270_s4, 4096 }
 0x11b   : > { %p1550_p6 = scmp.ne.s32.totalorder %s2088_s17, %s1549_s12  ;;  %p1554_p10 = scmp.lt.s32.totalorder %s2088_s17, %s2270_s4 }
 0x11c   : > { %p1555_p11 = scmp.lt.s32.totalorder %s1553_s16, %s1549_s12 }
 0x11d   : > { %p1551_p7 = pnand %p1550_p6, %p1751_p4 }
 0x11e   : > { %p1556_p12 = por %p1555_p11, %p1554_p10 }
 0x11f   : > { %p1552_p9 = pneg %p1551_p7 }
 0x121   : > { %p1557_p13 = pnand %p1556_p12, %p1552_p9 }
 0x123   : > { %1560 = shalt.err (!%p1557_p13)
}
 0x124   : > { %s1670_s19 = smov 64   ;;  %s1671_s30 = smov 4   ;;  %v1019_v57 = vadd.f32 %v1018_v30, %v1017_v29  ;;  %v918_v10 = vadd.f32 %v917_v13, %v916_v28  ;;  %v1020_v31 = vsel %vm871_vm3, %v966_v24, 0.0  ;;  %v919_v32 = vsel %vm871_vm3, %v2007_v37, 0.0 }
 0x125   : > { %1468 = dma.vmem_to_hbm [thread:$0]  (%p1751_p4), %s2090_s14, 2048, %s2088_s17, %s1046_s18, %s1670_s19, %s1670_s19, %s1671_s30   ;;  %v968_v34 = vmul.f32 %v2033_v51, %v2033_v51  ;;  %v969_v38 = vmul.f32 %v1995_v22, %v1995_v22  ;;  %v1022_v39 = vsel %vm871_vm3, %v967_v25, 0.0  ;;  %v921_v2 = vsel %vm871_vm3, %v2033_v51, 0.0 }
 0x126   : > { %v920_v35 = vadd.f32 %v919_v32, %v918_v10  ;;  %v1021_v36 = vadd.f32 %v1020_v31, %v1019_v57  ;;  %v923_v42 = vsel %vm871_vm3, %v1995_v22, 0.0  ;;  %v970_v37 = vmul.f32 %v2020_v44, %v2020_v44  ;;  %s2172_s28 = sand.u32 1, %s1235_s27   ;;  %s1296_s14 = sshll.u32 %s1659_s24, 4 }
 0x127   : > { %v1024_v43 = vsel %vm871_vm3, %v968_v34, 0.0  ;;  %v1026_v47 = vsel %vm871_vm3, %v969_v38, 0.0  ;;  %v925_v33 = vsel %vm871_vm3, %v2020_v44, 0.0  ;;  %v971_v49 = vmul.f32 %v2059_v3, %v2059_v3  ;;  %s285_s17 = scalar_lea.vmem [#allocation4], %s1893_s8  ;;  %s2274_s11 = scalar_lea.vmem [#allocation6], %s1893_s8 }
 0x128   : > { %v1023_v41 = vadd.f32 %v1022_v39, %v1021_v36  ;;  %v922_v11 = vadd.f32 %v921_v2, %v920_v35  ;;  %v1028_v52 = vsel %vm871_vm3, %v970_v37, 0.0  ;;  %v927_v22 = vsel %vm871_vm3, %v2059_v3, 0.0  ;;  %s1087_s18 = sshll.u32 %s285_s17, 4  ;;  %s1101_s12 = sshll.u32 %s2274_s11, 4  ;;  %s2184_s18 = int_to_ptr.vmem [resolvable:$true] %s1087_s18  ;;  %s2192_s12 = int_to_ptr.vmem [resolvable:$true] %s1101_s12 }
 0x129   : > { %v972_v53 = vmul.f32 %v2083_v18, %v2083_v18  ;;  %v973_v56 = vmul.f32 %v2046_v59, %v2046_v59  ;;  %v1030_v44 = vsel %vm871_vm3, %v971_v49, 0.0  ;;  %v929_v48 = vsel %vm871_vm3, %v2083_v18, 0.0  ;;  %s2182_s16 = scalar_lea.hbm %s2271_s5, %s1296_s14  ;;  %s2190_s20 = scalar_lea.hbm %s2272_s6, %s1296_s14 }
 0x12a   : > { %v924_v45 = vadd.f32 %v923_v42, %v922_v11  ;;  %v1025_v46 = vadd.f32 %v1024_v43, %v1023_v41  ;;  %v931_v61 = vsel %vm871_vm3, %v2046_v59, 0.0  ;;  %v974_v27 = vmul.f32 %v2072_v9, %v2072_v9  ;;  %s1561_s30 = scalar_lea.vmem %s2184_s18, 16  ;;  %s1672_s13 = smov [#allocation4]  }
 0x12b   : > { %v1032_v62 = vsel %vm871_vm3, %v972_v53, 0.0  ;;  %v1034_v3 = vsel %vm871_vm3, %v973_v56, 0.0  ;;  %v933_v4 = vsel %vm871_vm3, %v2072_v9, 0.0  ;;  %vm941_vm4 = vcmask 122880   ;;  %p1562_p0 = scmp.ne.s32.totalorder %s2184_s18, %s1561_s30  ;;  %s1565_s15 = sshll.u32 %s1672_s13, 4  ;;  %s1566_s15 = int_to_ptr.vmem [resolvable:$false] %s1565_s15 }
 0x12c   : > { %v1027_v50 = vadd.f32 %v1026_v47, %v1025_v46  ;;  %v926_v51 = vadd.f32 %v925_v33, %v924_v45  ;;  %v1036_v40 = vsel %vm871_vm3, %v974_v27, 0.0  ;;  %s1567_s11 = scalar_lea.vmem %s1566_s15, 32  ;;  %p1568_p3 = scmp.lt.s32.totalorder %s2184_s18, %s1566_s15 }
 0x12d   : > { %p1563_p1 = pnand %p1562_p0, %p1751_p4  ;;  %p1569_p5 = scmp.lt.s32.totalorder %s1567_s11, %s1561_s30 }
 0x12e   : > { %v928_v54 = vadd.f32 %v927_v22, %v926_v51  ;;  %v1029_v55 = vadd.f32 %v1028_v52, %v1027_v50 }
 0x12f   : > { %p1564_p2 = pneg %p1563_p1  ;;  %p1570_p6 = por %p1569_p5, %p1568_p3 }
 0x130   : > { %v1031_v58 = vadd.f32 %v1030_v44, %v1029_v55  ;;  %v930_v60 = vadd.f32 %v929_v48, %v928_v54 }
 0x131   : > { %p1571_p7 = pnand %p1570_p6, %p1564_p2 }
 0x132   : > { %v932_v63 = vadd.f32 %v931_v61, %v930_v60  ;;  %v1033_v0 = vadd.f32 %v1032_v62, %v1031_v58 }
 0x134   : > { %v934_v5 = vadd.f32 %v933_v4, %v932_v63  ;;  %v1035_v6 = vadd.f32 %v1034_v3, %v1033_v0 }
 0x136   : > { %v935_v59 = vrot.slane %v934_v5, 4  ;;  %v1037_v7 = vadd.f32 %v1036_v40, %v1035_v6 }
 0x138   : > { %v936_v8 = vadd.f32 %v935_v59, %v934_v5  ;;  %v1038_v12 = vrot.slane %v1037_v7, 4 }
 0x13a   : > { %v937_v14 = vrot.slane %v936_v8, 2  ;;  %v1039_v15 = vadd.f32 %v1038_v12, %v1037_v7 }
 0x13c   : > { %v1040_v16 = vrot.slane %v1039_v15, 2  ;;  %v938_v1 = vadd.f32 %v937_v14, %v936_v8 }
 0x13e   : > { %v939_v9 = vrot.slane %v938_v1, 1  ;;  %v1041_v17 = vadd.f32 %v1040_v16, %v1039_v15 }
 0x140   : > { %v940_v18 = vadd.f32 %v939_v9, %v938_v1  ;;  %v1042_v19 = vrot.slane %v1041_v17, 1 }
 0x142   : > { %942 = vst.msk [vmem:[%s285_s17] sm:$0x1] %vm941_vm4, %v940_v18  ;;  %v1043_v20 = vadd.f32 %v1042_v19, %v1041_v17 }
 0x143   : > { %1574 = shalt.err (!%p1571_p7)
}
 0x144   : > { %s1575_s14 = scalar_lea.hbm %s2182_s16, 16  ;;  %s1579_s27 = scalar_lea.hbm %s2271_s5, 32 }
 0x145   : > { %p1576_p9 = scmp.ne.s32.totalorder %s2182_s16, %s1575_s14  ;;  %p1580_p12 = scmp.lt.s32.totalorder %s2182_s16, %s2271_s5 }
 0x146   : > { %p1581_p13 = scmp.lt.s32.totalorder %s1579_s27, %s1575_s14 }
 0x147   : > { %p1577_p10 = pnand %p1576_p9, %p1751_p4 }
 0x148   : > { %p1582_p0 = por %p1581_p13, %p1580_p12 }
 0x149   : > { %p1578_p11 = pneg %p1577_p10 }
 0x14b   : > { %p1583_p1 = pnand %p1582_p0, %p1578_p11 }
 0x14d   : > { %1586 = shalt.err (!%p1583_p1)
}
 0x14e   : > { %s2277_s11 = scalar_lea.sflag [#allocation5], %s2172_s28  ;;  %s2278_s30 = scalar_lea.vmem [#allocation6], %s1893_s8 }
 0x14f   : > { %1469 = dma.vmem_to_hbm [thread:$0]  (%p1751_p4), %s2184_s18, 16, %s2182_s16, %s2277_s11   ;;  %1044 = vst.msk [vmem:[%s2278_s30] sm:$0x1] %vm941_vm4, %v1043_v20 }
 0x150   : > { %s1587_s19 = scalar_lea.vmem %s2192_s12, 16  ;;  %s1673_s15 = smov [#allocation6]  }
 0x151   : > { %p1588_p2 = scmp.ne.s32.totalorder %s2192_s12, %s1587_s19  ;;  %s1591_s14 = sshll.u32 %s1673_s15, 4  ;;  %s1592_s14 = int_to_ptr.vmem [resolvable:$false] %s1591_s14 }
 0x152   : > { %s1593_s17 = scalar_lea.vmem %s1592_s14, 32  ;;  %p1594_p6 = scmp.lt.s32.totalorder %s2192_s12, %s1592_s14 }
 0x153   : > { %p1589_p3 = pnand %p1588_p2, %p1751_p4  ;;  %p1595_p7 = scmp.lt.s32.totalorder %s1593_s17, %s1587_s19 }
 0x155   : > { %p1590_p5 = pneg %p1589_p3  ;;  %p1596_p9 = por %p1595_p7, %p1594_p6 }
 0x157   : > { %p1597_p10 = pnand %p1596_p9, %p1590_p5 }
 0x159   : > { %1600 = shalt.err (!%p1597_p10)
}
 0x15a   : > { %s1601_s8 = scalar_lea.hbm %s2190_s20, 16  ;;  %s1605_s24 = scalar_lea.hbm %s2272_s6, 32 }
 0x15b   : > { %p1602_p11 = scmp.ne.s32.totalorder %s2190_s20, %s1601_s8  ;;  %p1606_p0 = scmp.lt.s32.totalorder %s2190_s20, %s2272_s6 }
 0x15c   : > { %p1607_p1 = scmp.lt.s32.totalorder %s1605_s24, %s1601_s8 }
 0x15d   : > { %p1603_p12 = pnand %p1602_p11, %p1751_p4 }
 0x15e   : > { %p1608_p2 = por %p1607_p1, %p1606_p0 }
 0x15f   : > { %p1604_p13 = pneg %p1603_p12 }
 0x161   : > { %p1609_p3 = pnand %p1608_p2, %p1604_p13 }
 0x163   : > { %1612 = shalt.err (!%p1609_p3)
}
 0x164   : > { %1470 = dma.vmem_to_hbm [thread:$0]  (%p1751_p4), %s2192_s12, 16, %s2190_s20, %s2277_s11  }
 0x165 PF: > { %p1484_p5 = scmp.ge.s32.totalorder %s1667_s26, 2  ;;  %s1113_s30 = sand.u32 1, %s1647_s21  }
 0x166   : > { %s1114_s19 = scalar_lea.sflag [#allocation3], %s1113_s30 }
 0x167   : > { %p1475_p6 = pnand %p1484_p5, %p1760_p8 }
 0x169   : > { %p1476_p7 = pneg %p1475_p6 }
 0x16b   : > { %1638 = dma.done.wait (%p1476_p7), %s1114_s19, 2048  }
 0x16c   : > { %1640 = vsyncadd (%p1476_p7), %s1114_s19, 4294965248  ;;  %s2279_s15 = sadd.s32 4294967294, %s1667_s26  }
 0x16d   : > { %s1122_s7 = sand.u32 1, %s2279_s15  }
 0x16e   : > { %s1123_s14 = scalar_lea.sflag [#allocation5], %s1122_s7 }
 0x16f   : > { %1642 = dma.done.wait (%p1476_p7), %s1123_s14, 32  }
 0x170   : > { %1644 = vsyncadd (%p1476_p7), %s1123_s14, 4294967264  ;;  %s23_s26 = sadd.s32 1, %s1667_s26   ;;  %s2280_s21 = smov %s1651_s22 }
 0x171   : > { %p20_p4 = scmp.ge.s32.totalorder %s23_s26, 4   ;;  %s2281_s22 = smov %s1655_s23 }
 0x172   : > { %s2282_s23 = smov %s1766_s10  ;;  %s2283_s24 = smov %s1663_s25 }
 0x173   : > { %s2284_s25 = smov %s2286_s29  ;;  %22 = sbr.rel (!%p20_p4) target bundleno = 6 (0x6), region = 103 }
 0x178   :  { %1135 = vsyncpa [#allocation3], 1 }
 0x179   :  { %1137 = vsyncpa [#allocation3 + $0x1], 1 }
 0x17a   :  { %1138 = vsyncpa [#allocation5], 1 }
 0x17b   :  { %1140 = vsyncpa [#allocation5 + $0x1], 1 }

</bundles_post_ra>
